<compile_context>
chip_gen: v6e
topology: v6e:2x2x1
jax: 0.10.0
libtpu: 0.0.40
codegen_flags: <defaults>
</compile_context>

<pallas_src>
import math

import jax
import jax.numpy as jnp
from jax import lax
from jax.experimental import pallas as pl
from jax.experimental.pallas import tpu as pltpu

# --- module "globals" (deterministic config) --------------------------------
LIKELIHOOD_X = "bernoulli"
EPS = 1e-8
LREC = 1.0
LKLD = 1.0
LOG_2PI = math.log(2.0 * math.pi)

LANE = 1024                 # lane-dense slab width (multiple of 128)
DEFAULT_TILE_ROWS = 512     # 512x1024 f32 tile = 2 MiB per input, per buffer


def _round_up(x: int, m: int) -> int:
    return ((x + m - 1) // m) * m


def _make_kernel(likelihood: str, *, n_valid: int, batch: int, tile_rows: int,
                 lane: int, grid_steps: int, needs_mask: bool):
    """Build the branch-specific kernel. Output: (3,) SMEM = (loss, nll, nkld)."""
    inv_b = 1.0 / float(batch)

    def _masked(per_elem, step):
        if not needs_mask:
            return per_elem
        row = lax.broadcasted_iota(jnp.int32, (tile_rows, lane), 0)
        col = lax.broadcasted_iota(jnp.int32, (tile_rows, lane), 1)
        flat = (row + step * tile_rows) * lane + col
        return jnp.where(flat < n_valid, per_elem, 0.0)

    def _init(step, acc_ref):
        @pl.when(step == 0)
        def _():
            acc_ref[0] = jnp.float32(0.0)

    def _finalize(step, mean_ref, log_var_ref, out_ref, acc_ref):
        @pl.when(step == grid_steps - 1)
        def _():
            m = mean_ref[...].astype(jnp.float32)
            lv = log_var_ref[...].astype(jnp.float32)
            # mean over batch of per-sample sums == total sum / B
            mkld = 0.5 * jnp.sum(1.0 + lv - m * m - jnp.exp(lv)) * inv_b
            ll = acc_ref[0] * inv_b
            loss = -1.0 * (LREC * ll + LKLD * mkld)
            out_ref[0] = loss
            out_ref[1] = -1.0 * ll
            out_ref[2] = -1.0 * mkld

    if likelihood == "bernoulli":
        def kernel(mean_ref, log_var_ref, x_ref, y_ref, out_ref, acc_ref):
            step = pl.program_id(0)
            _init(step, acc_ref)
            x = x_ref[...].astype(jnp.float32)
            y = y_ref[...].astype(jnp.float32)
            per_elem = x * jnp.log(y + EPS) + (1.0 - x) * jnp.log(1.0 - y + EPS)
            per_elem = _masked(per_elem, step)
            acc_ref[0] = acc_ref[0] + jnp.sum(per_elem)
            _finalize(step, mean_ref, log_var_ref, out_ref, acc_ref)
        return kernel

    if likelihood == "gaussian":
        def kernel(mean_ref, log_var_ref, x_ref, mu_ref, lv_ref, out_ref, acc_ref):
            step = pl.program_id(0)
            _init(step, acc_ref)
            x = x_ref[...].astype(jnp.float32)
            mu = mu_ref[...].astype(jnp.float32)
            lv = lv_ref[...].astype(jnp.float32)
            d = x - mu
            # log(2*pi*exp(lv)) == log(2*pi) + lv ; divide -> multiply by exp(-lv)
            per_elem = -0.5 * ((LOG_2PI + lv) + d * d * jnp.exp(-lv))
            per_elem = _masked(per_elem, step)
            acc_ref[0] = acc_ref[0] + jnp.sum(per_elem)
            _finalize(step, mean_ref, log_var_ref, out_ref, acc_ref)
        return kernel

    raise ValueError(f"unknown likelihood: {likelihood}")


def vae_loss(mean, log_var, input_data, output_data, output_data_mean,
             output_data_log_var, likelihood: str = LIKELIHOOD_X,
             tile_rows: int = DEFAULT_TILE_ROWS):
    """Pallas-backed forward of VAELoss. Returns (loss, -log_likelihood, -minus_kld)."""
    likelihood = likelihood.lower()
    B = input_data.shape[0]
    D = int(math.prod(input_data.shape[1:]))
    N = B * D
    Z = mean.shape[1]

    rows_needed = pl.cdiv(N, LANE)
    eff_tile_rows = min(_round_up(tile_rows, 8), _round_up(rows_needed, 8))
    padded_rows = _round_up(rows_needed, eff_tile_rows)
    grid_steps = padded_rows // eff_tile_rows
    padded_total = padded_rows * LANE
    needs_mask = (padded_total != N)

    def to_slab(a):
        flat = a.reshape(-1)
        if needs_mask:
            flat = jnp.pad(flat, (0, padded_total - N))
        return flat.reshape(padded_rows, LANE)

    # Only DMA what the chosen likelihood actually reads.
    if likelihood == "bernoulli":
        slabs = (to_slab(input_data), to_slab(output_data))
        transcendentals = 2 * padded_total + B * Z
    elif likelihood == "gaussian":
        slabs = (to_slab(input_data), to_slab(output_data_mean),
                 to_slab(output_data_log_var))
        transcendentals = padded_total + B * Z
    else:
        raise ValueError(f"unknown likelihood: {likelihood}")

    kernel = _make_kernel(likelihood, n_valid=N, batch=B,
                          tile_rows=eff_tile_rows, lane=LANE,
                          grid_steps=grid_steps, needs_mask=needs_mask)

    img_spec = pl.BlockSpec((eff_tile_rows, LANE), lambda i: (i, 0))
    latent_spec = pl.BlockSpec((B, Z), lambda i: (0, 0))   # resident across grid

    bytes_accessed = int(sum(s.size * s.dtype.itemsize for s in slabs)
                         + mean.size * mean.dtype.itemsize
                         + log_var.size * log_var.dtype.itemsize + 3 * 4)
    flops = int(6 * padded_total + 6 * B * Z)

    out = pl.pallas_call(
        kernel,
        out_shape=jax.ShapeDtypeStruct((3,), jnp.float32),
        grid_spec=pltpu.PrefetchScalarGridSpec(
            num_scalar_prefetch=0,
            grid=(grid_steps,),
            in_specs=[latent_spec, latent_spec] + [img_spec] * len(slabs),
            out_specs=pl.BlockSpec(memory_space=pltpu.MemorySpace.SMEM),
            scratch_shapes=[pltpu.SMEM((1,), jnp.float32)],
        ),
        compiler_params=pltpu.CompilerParams(
            dimension_semantics=("arbitrary",),
            vmem_limit_bytes=32 * 1024 * 1024,
        ),
        cost_estimate=pl.CostEstimate(flops=flops,
                                      transcendentals=transcendentals,
                                      bytes_accessed=bytes_accessed),
    )(mean, log_var, *slabs)

    return out[0], out[1], out[2]


def _reference(mean, log_var, x, y, y_mu, y_lv, likelihood: str):
    """Plain-JAX reference matching the PyTorch semantics."""
    x = x.astype(jnp.float32)
    if likelihood.lower() == "bernoulli":
        y = y.astype(jnp.float32)
        ll = jnp.mean(jnp.sum(x * jnp.log(y + EPS)
                              + (1.0 - x) * jnp.log(1.0 - y + EPS),
                              axis=(1, 2, 3)))
    else:
        y_mu = y_mu.astype(jnp.float32)
        var = jnp.exp(y_lv.astype(jnp.float32))
        ll = jnp.mean(jnp.sum(-0.5 * (jnp.log(2.0 * jnp.pi * var)
                                      + (x - y_mu) ** 2 / var),
                              axis=(1, 2, 3)))
    mean = mean.astype(jnp.float32)
    log_var = log_var.astype(jnp.float32)
    mkld = jnp.mean(0.5 * jnp.sum(1.0 + log_var - mean * mean - jnp.exp(log_var),
                                  axis=1))
    loss = -1.0 * (LREC * ll + LKLD * mkld)
    return loss, -1.0 * ll, -1.0 * mkld


def _run_case(key, B, C, H, W, Z, tile_rows):
    k1, k2, k3, k4, k5, k6 = jax.random.split(key, 6)
    mean = jax.random.normal(k1, (B, Z), dtype=jnp.float32)
    log_var = 0.1 * jax.random.normal(k2, (B, Z), dtype=jnp.float32)
    x = jax.random.uniform(k3, (B, C, H, W), dtype=jnp.float32)            # targets in [0,1]
    y = jax.nn.sigmoid(jax.random.normal(k4, (B, C, H, W), jnp.float32))   # probs in (0,1)
    y_mu = jax.random.normal(k5, (B, C, H, W), dtype=jnp.float32)
    y_lv = 0.1 * jax.random.normal(k6, (B, C, H, W), dtype=jnp.float32)

    for lk in ("bernoulli", "gaussian"):
        loss, nll, nkld = vae_loss(mean, log_var, x, y, y_mu, y_lv,
                                   likelihood=lk, tile_rows=tile_rows)
        jax.block_until_ready((loss, nll, nkld))
        r_loss, r_nll, r_nkld = _reference(mean, log_var, x, y, y_mu, y_lv, lk)
        assert jnp.allclose(loss, r_loss, rtol=1e-5, atol=1e-4), (lk, loss, r_loss)
        assert jnp.allclose(nll, r_nll, rtol=1e-5, atol=1e-4), (lk, nll, r_nll)
        assert jnp.allclose(nkld, r_nkld, rtol=1e-5, atol=1e-4), (lk, nkld, r_nkld)


if __name__ == "__main__":
    key = jax.random.PRNGKey(0)
    k_a, k_b = jax.random.split(key)

    # Small primary shape (exercises the tail-mask path, single grid step).
    _run_case(k_a, B=2, C=4, H=16, W=16, Z=32, tile_rows=DEFAULT_TILE_ROWS)

    # Slightly larger shape with a small tile -> multi-step grid accumulation,
    # no padding (exercises the pipelined-accumulator path).
    _run_case(k_b, B=2, C=4, H=64, W=64, Z=32, tile_rows=8)

    print("KERNEL_OK")
</pallas_src>

<mosaic_0001>
module attributes {stable_mosaic.version = 11 : i64} {
  func.func @kernel(%arg0: i32, %arg1: memref<2x32xf32, #tpu.memory_space<vmem>>, %arg2: memref<2x32xf32, #tpu.memory_space<vmem>>, %arg3: memref<8x1024xf32, #tpu.memory_space<vmem>>, %arg4: memref<8x1024xf32, #tpu.memory_space<vmem>>, %arg5: memref<3xf32, #tpu.memory_space<smem>>, %arg6: memref<1xf32, #tpu.memory_space<smem>>) attributes {dimension_semantics = [#tpu.dimension_semantics<arbitrary>], iteration_bounds = array<i64: 1>, scalar_prefetch = 0 : i64, scratch_operands = 1 : i64, tpu.core_type = #tpu.core_type<tc>, window_params = [{pipeline_mode = #tpu.pipeline_mode<synchronous>, transform_indices = @transform_0, window_bounds = array<i64: 2, 32>}, {pipeline_mode = #tpu.pipeline_mode<synchronous>, transform_indices = @transform_1, window_bounds = array<i64: 2, 32>}, {transform_indices = @transform_2, window_bounds = array<i64: 8, 1024>}, {transform_indices = @transform_3, window_bounds = array<i64: 8, 1024>}, {transform_indices = @transform_4, window_bounds = array<i64: 3>}]} {
    %c0_i32 = arith.constant 0 : i32
    %0 = arith.cmpi eq, %arg0, %c0_i32 : i32
    %1 = arith.extui %0 : i1 to i32
    %c0_i32_0 = arith.constant 0 : i32
    %2 = arith.cmpi ne, %1, %c0_i32_0 : i32
    scf.if %2 {
      %cst_13 = arith.constant 0.000000e+00 : f32
      %c0_14 = arith.constant 0 : index
      %40 = memref.load %arg6[%c0_14] : memref<1xf32, #tpu.memory_space<smem>>
      memref.store %cst_13, %arg6[%c0_14] : memref<1xf32, #tpu.memory_space<smem>>
    } else {
    }
    %c0 = arith.constant 0 : index
    %c0_1 = arith.constant 0 : index
    %3 = vector.load %arg3[%c0, %c0_1] : memref<8x1024xf32, #tpu.memory_space<vmem>>, vector<8x1024xf32>
    %c0_2 = arith.constant 0 : index
    %c0_3 = arith.constant 0 : index
    %4 = vector.load %arg4[%c0_2, %c0_3] : memref<8x1024xf32, #tpu.memory_space<vmem>>, vector<8x1024xf32>
    %cst = arith.constant 9.99999993E-9 : f32
    %5 = vector.broadcast %cst : f32 to vector<8x1024xf32>
    %6 = arith.addf %4, %5 : vector<8x1024xf32>
    %7 = math.log %6 : vector<8x1024xf32>
    %8 = arith.mulf %3, %7 : vector<8x1024xf32>
    %cst_4 = arith.constant 1.000000e+00 : f32
    %9 = vector.broadcast %cst_4 : f32 to vector<8x1024xf32>
    %10 = arith.subf %9, %3 : vector<8x1024xf32>
    %cst_5 = arith.constant 1.000000e+00 : f32
    %11 = vector.broadcast %cst_5 : f32 to vector<8x1024xf32>
    %12 = arith.subf %11, %4 : vector<8x1024xf32>
    %cst_6 = arith.constant 9.99999993E-9 : f32
    %13 = vector.broadcast %cst_6 : f32 to vector<8x1024xf32>
    %14 = arith.addf %12, %13 : vector<8x1024xf32>
    %15 = math.log %14 : vector<8x1024xf32>
    %16 = arith.mulf %10, %15 : vector<8x1024xf32>
    %17 = arith.addf %8, %16 : vector<8x1024xf32>
    %18 = tpu.iota {dimensions = array<i32: 0>} : vector<8x1024xi32>
    %19 = tpu.iota {dimensions = array<i32: 1>} : vector<8x1024xi32>
    %c8_i32 = arith.constant 8 : i32
    %20 = arith.muli %arg0, %c8_i32 : i32
    %21 = vector.broadcast %20 : i32 to vector<8x1024xi32>
    %22 = arith.addi %18, %21 : vector<8x1024xi32>
    %c1024_i32 = arith.constant 1024 : i32
    %23 = vector.broadcast %c1024_i32 : i32 to vector<8x1024xi32>
    %24 = arith.muli %22, %23 : vector<8x1024xi32>
    %25 = arith.addi %24, %19 : vector<8x1024xi32>
    %c2048_i32 = arith.constant 2048 : i32
    %26 = vector.broadcast %c2048_i32 : i32 to vector<8x1024xi32>
    %27 = arith.cmpi slt, %25, %26 : vector<8x1024xi32>
    %cst_7 = arith.constant 0.000000e+00 : f32
    %28 = vector.broadcast %cst_7 : f32 to vector<8x1024xf32>
    %29 = arith.select %27, %17, %28 : vector<8x1024xi1>, vector<8x1024xf32>
    %c0_8 = arith.constant 0 : index
    %30 = memref.load %arg6[%c0_8] : memref<1xf32, #tpu.memory_space<smem>>
    %31 = vector.shape_cast %29 : vector<8x1024xf32> to vector<1x8x1024xf32>
    %cst_9 = arith.constant dense<0.000000e+00> : vector<1xf32>
    %32 = vector.multi_reduction <add>, %31, %cst_9 [1, 2] : vector<1x8x1024xf32> to vector<1xf32>
    %33 = vector.shape_cast %32 : vector<1xf32> to vector<1x1x1xf32>
    %34 = vector.extract %33[0, 0, 0] : f32 from vector<1x1x1xf32>
    %35 = arith.addf %30, %34 : f32
    %c0_10 = arith.constant 0 : index
    %36 = memref.load %arg6[%c0_10] : memref<1xf32, #tpu.memory_space<smem>>
    memref.store %35, %arg6[%c0_10] : memref<1xf32, #tpu.memory_space<smem>>
    %c0_i32_11 = arith.constant 0 : i32
    %37 = arith.cmpi eq, %arg0, %c0_i32_11 : i32
    %38 = arith.extui %37 : i1 to i32
    %c0_i32_12 = arith.constant 0 : i32
    %39 = arith.cmpi ne, %38, %c0_i32_12 : i32
    scf.if %39 {
      %c0_13 = arith.constant 0 : index
      %c0_14 = arith.constant 0 : index
      %40 = vector.load %arg1[%c0_13, %c0_14] : memref<2x32xf32, #tpu.memory_space<vmem>>, vector<2x32xf32>
      %c0_15 = arith.constant 0 : index
      %c0_16 = arith.constant 0 : index
      %41 = vector.load %arg2[%c0_15, %c0_16] : memref<2x32xf32, #tpu.memory_space<vmem>>, vector<2x32xf32>
      %cst_17 = arith.constant 1.000000e+00 : f32
      %42 = vector.broadcast %cst_17 : f32 to vector<2x32xf32>
      %43 = arith.addf %42, %41 : vector<2x32xf32>
      %44 = arith.mulf %40, %40 : vector<2x32xf32>
      %45 = arith.subf %43, %44 : vector<2x32xf32>
      %46 = math.exp %41 : vector<2x32xf32>
      %47 = arith.subf %45, %46 : vector<2x32xf32>
      %48 = vector.shape_cast %47 : vector<2x32xf32> to vector<1x2x32xf32>
      %cst_18 = arith.constant dense<0.000000e+00> : vector<1xf32>
      %49 = vector.multi_reduction <add>, %48, %cst_18 [1, 2] : vector<1x2x32xf32> to vector<1xf32>
      %50 = vector.shape_cast %49 : vector<1xf32> to vector<1x1x1xf32>
      %51 = vector.extract %50[0, 0, 0] : f32 from vector<1x1x1xf32>
      %cst_19 = arith.constant 5.000000e-01 : f32
      %52 = arith.mulf %cst_19, %51 : f32
      %cst_20 = arith.constant 5.000000e-01 : f32
      %53 = arith.mulf %52, %cst_20 : f32
      %c0_21 = arith.constant 0 : index
      %54 = memref.load %arg6[%c0_21] : memref<1xf32, #tpu.memory_space<smem>>
      %cst_22 = arith.constant 5.000000e-01 : f32
      %55 = arith.mulf %54, %cst_22 : f32
      %cst_23 = arith.constant 1.000000e+00 : f32
      %56 = arith.mulf %cst_23, %55 : f32
      %cst_24 = arith.constant 1.000000e+00 : f32
      %57 = arith.mulf %cst_24, %53 : f32
      %58 = arith.addf %56, %57 : f32
      %cst_25 = arith.constant -1.000000e+00 : f32
      %59 = arith.mulf %cst_25, %58 : f32
      %c0_26 = arith.constant 0 : index
      %60 = memref.load %arg5[%c0_26] : memref<3xf32, #tpu.memory_space<smem>>
      memref.store %59, %arg5[%c0_26] : memref<3xf32, #tpu.memory_space<smem>>
      %cst_27 = arith.constant -1.000000e+00 : f32
      %61 = arith.mulf %cst_27, %55 : f32
      %c1 = arith.constant 1 : index
      %62 = memref.load %arg5[%c1] : memref<3xf32, #tpu.memory_space<smem>>
      memref.store %61, %arg5[%c1] : memref<3xf32, #tpu.memory_space<smem>>
      %cst_28 = arith.constant -1.000000e+00 : f32
      %63 = arith.mulf %cst_28, %53 : f32
      %c2 = arith.constant 2 : index
      %64 = memref.load %arg5[%c2] : memref<3xf32, #tpu.memory_space<smem>>
      memref.store %63, %arg5[%c2] : memref<3xf32, #tpu.memory_space<smem>>
    } else {
    }
    return
  }
  func.func @transform_0(%arg0: i32) -> (i32, i32) {
    %c0_i32 = arith.constant 0 : i32
    %c0_i32_0 = arith.constant 0 : i32
    %c0_i32_1 = arith.constant 0 : i32
    return %c0_i32, %c0_i32_0 : i32, i32
  }
  func.func @transform_1(%arg0: i32) -> (i32, i32) {
    %c0_i32 = arith.constant 0 : i32
    %c0_i32_0 = arith.constant 0 : i32
    %c0_i32_1 = arith.constant 0 : i32
    return %c0_i32, %c0_i32_0 : i32, i32
  }
  func.func @transform_2(%arg0: i32) -> (i32, i32) {
    %c0_i32 = arith.constant 0 : i32
    %c0_i32_0 = arith.constant 0 : i32
    return %arg0, %c0_i32 : i32, i32
  }
  func.func @transform_3(%arg0: i32) -> (i32, i32) {
    %c0_i32 = arith.constant 0 : i32
    %c0_i32_0 = arith.constant 0 : i32
    return %arg0, %c0_i32 : i32, i32
  }
  func.func @transform_4(%arg0: i32) -> i32 {
    %c0_i32 = arith.constant 0 : i32
    %c0_i32_0 = arith.constant 0 : i32
    return %c0_i32 : i32
  }
}

</mosaic_0001>

<bundles_post_ra>
// kernel: tpu_custom_call.1
= control target key start
LH: loop header
LB: loop body
LE: loop exit
PB: predicated region body
PF: predicated region fallthrough
CT: control target
= control target key end

     0   :  { %9 = vsyncpa [#allocation4], 0  ;;  %s550_s0 = inlined_call_operand.hbm [shape: f32[2,32], index: 0, kind: input, shape index: {}]   ;;  %s551_s1 = inlined_call_operand.hbm [shape: f32[2,32], index: 1, kind: input, shape index: {}]   ;;  %s552_s2 = inlined_call_operand.hbm [shape: f32[8,1024], index: 2, kind: input, shape index: {}]   ;;  %s553_s3 = inlined_call_operand.hbm [shape: f32[8,1024], index: 3, kind: input, shape index: {}]   ;;  %s554_s4 = inlined_call_operand.hbm [shape: f32[3], index: 4, kind: output, shape index: {}]  }
   0x1   :  { %10 = vsyncpa [#allocation7], 0 }
   0x2   :  { %11 = vsyncpa [#allocation10], 0 }
   0x3   :  { %12 = vsyncpa [#allocation5], 0  ;;  %s425_s15 = smov [#allocation6]   ;;  %s426_s17 = smov [#allocation3]  }
   0x4   :  { %s29_s16 = sshll.u32 %s425_s15, 4  ;;  %s19_s18 = sshll.u32 %s426_s17, 4  ;;  %s30_s16 = int_to_ptr.vmem [resolvable:$true] %s29_s16  ;;  %s20_s18 = int_to_ptr.vmem [resolvable:$true] %s19_s18 }
   0x5   :  { %s337_s19 = scalar_lea.vmem %s30_s16, 32  ;;  %p342_p1 = scmp.lt.s32.totalorder %s30_s16, %s30_s16 }
   0x6   :  { %p338_p0 = scmp.ne.s32.totalorder %s30_s16, %s337_s19  ;;  %p343_p2 = scmp.lt.s32.totalorder %s337_s19, %s337_s19 }
   0x8   :  { %p344_p3 = por %p343_p2, %p342_p1 }
   0xa   :  { %p345_p4 = pnand %p344_p3, %p338_p0 }
   0xc   :  { %348 = shalt.err (!%p345_p4)
}
   0xd   :  { %32 = dma.hbm_to_vmem [thread:$0]  %s551_s1, 32, %s30_s16, [#allocation7]  }
   0xe   :  { %s357_s22 = scalar_lea.vmem %s20_s18, 32  ;;  %p362_p6 = scmp.lt.s32.totalorder %s20_s18, %s20_s18 }
   0xf   :  { %p358_p5 = scmp.ne.s32.totalorder %s20_s18, %s357_s22  ;;  %p363_p7 = scmp.lt.s32.totalorder %s357_s22, %s357_s22 }
  0x11   :  { %p364_p8 = por %p363_p7, %p362_p6 }
  0x13   :  { %p365_p9 = pnand %p364_p8, %p358_p5 }
  0x15   :  { %368 = shalt.err (!%p365_p9)
}
  0x16   :  { %22 = dma.hbm_to_vmem [thread:$0]  %s550_s0, 32, %s20_s18, [#allocation4]  }
  0x17   :  { %s427_s25 = smov [#allocation8]   ;;  %s428_s27 = smov [#allocation9]  }
  0x18   :  { %s39_s26 = sshll.u32 %s427_s25, 4  ;;  %s49_s28 = sshll.u32 %s428_s27, 4  ;;  %s40_s26 = int_to_ptr.vmem [resolvable:$true] %s39_s26  ;;  %s50_s28 = int_to_ptr.vmem [resolvable:$true] %s49_s28 }
  0x19   :  { %s377_s29 = scalar_lea.vmem %s40_s26, 1024  ;;  %p382_p11 = scmp.lt.s32.totalorder %s40_s26, %s40_s26 }
  0x1a   :  { %p378_p10 = scmp.ne.s32.totalorder %s40_s26, %s377_s29  ;;  %p383_p12 = scmp.lt.s32.totalorder %s377_s29, %s377_s29 }
  0x1c   :  { %p384_p13 = por %p383_p12, %p382_p11 }
  0x1e   :  { %p385_p0 = pnand %p384_p13, %p378_p10 }
  0x20   :  { %388 = shalt.err (!%p385_p0)
}
  0x21   :  { %42 = dma.hbm_to_vmem [thread:$0]  %s552_s2, 1024, %s40_s26, [#allocation7]  }
  0x22   :  { %s397_s5 = scalar_lea.vmem %s50_s28, 1024  ;;  %p402_p2 = scmp.lt.s32.totalorder %s50_s28, %s50_s28 }
  0x23   :  { %p398_p1 = scmp.ne.s32.totalorder %s50_s28, %s397_s5  ;;  %p403_p3 = scmp.lt.s32.totalorder %s397_s5, %s397_s5 }
  0x25   :  { %p404_p4 = por %p403_p3, %p402_p2 }
  0x27   :  { %p405_p5 = pnand %p404_p4, %p398_p1 }
  0x29   :  { %408 = shalt.err (!%p405_p5)
}
  0x2a   :  { %52 = dma.hbm_to_vmem [thread:$0]  %s553_s3, 1024, %s50_s28, [#allocation10]  }
  0x2b   :  { %417 = dma.done.wait [#allocation4], 32  }
  0x2c   :  { %418 = vsyncadd [#allocation4], 4294967264 }
  0x2d   :  { %419 = dma.done.wait [#allocation7], 1056  }
  0x2e   :  { %420 = vsyncadd [#allocation7], 4294966240 }
  0x2f   :  { %421 = dma.done.wait [#allocation10], 1024  }
  0x30   :  { %422 = vsyncadd [#allocation10], 4294966272  ;;  %v79_v0 = vld [vmem:[#allocation9] sm:$0xff]  ;;  %v80_v1 = vld [vmem:[#allocation9 + $0x8] sm:$0xff]  ;;  %v175_v20 = vlaneseq  ;;  %vm245_vm8 = vcmask 254976   ;;  %s429_s14 = smov [#allocation11]  }
  0x31   :  { %v87_v2 = vadd.f32 1e-08, %v79_v0  ;;  %v81_v3 = vld [vmem:[#allocation9 + $0x10] sm:$0xff]  ;;  %v82_v4 = vld [vmem:[#allocation9 + $0x18] sm:$0xff]  ;;  %v83_v5 = vld [vmem:[#allocation9 + $0x20] sm:$0xff]  ;;  %v127_v10 = vsub.f32 1.0, %v79_v0 }
  0x32   :  { %v88_v6 = vadd.f32 1e-08, %v80_v1  ;;  %v84_v7 = vld [vmem:[#allocation9 + $0x28] sm:$0xff]  ;;  %v89_v8 = vadd.f32 1e-08, %v81_v3  ;;  %v85_v11 = vld [vmem:[#allocation9 + $0x30] sm:$0xff] }
  0x33   :  { %v90_v9 = vadd.f32 1e-08, %v82_v4  ;;  %295 = vlog2.f32 %v87_v2  ;;  %v91_v12 = vadd.f32 1e-08, %v83_v5  ;;  %v92_v13 = vadd.f32 1e-08, %v84_v7 }
  0x34   :  { %297 = vlog2.f32 %v88_v6  ;;  %v86_v14 = vld [vmem:[#allocation9 + $0x38] sm:$0xff]  ;;  %v93_v15 = vadd.f32 1e-08, %v85_v11  ;;  %v128_v16 = vsub.f32 1.0, %v80_v1  ;;  %v129_v17 = vsub.f32 1.0, %v81_v3  ;;  %v469_v40 = vld [vmem:[#allocation8] sm:$0xff] }
  0x35   :  { %299 = vlog2.f32 %v89_v8  ;;  %v94_v18 = vadd.f32 1e-08, %v86_v14  ;;  %v130_v19 = vsub.f32 1.0, %v82_v4  ;;  %v131_v21 = vsub.f32 1.0, %v83_v5  ;;  %v471_v43 = vld [vmem:[#allocation8 + $0x8] sm:$0xff]  ;;  %v473_v44 = vld [vmem:[#allocation8 + $0x10] sm:$0xff] }
  0x36   :  { %301 = vlog2.f32 %v90_v9  ;;  %v135_v22 = vadd.f32 1e-08, %v127_v10  ;;  %v132_v23 = vsub.f32 1.0, %v84_v7  ;;  %v136_v24 = vadd.f32 1e-08, %v128_v16  ;;  %v475_v45 = vld [vmem:[#allocation8 + $0x18] sm:$0xff] }
  0x37   :  { %303 = vlog2.f32 %v91_v12  ;;  %v133_v25 = vsub.f32 1.0, %v85_v11  ;;  %v137_v26 = vadd.f32 1e-08, %v129_v17  ;;  %v134_v27 = vsub.f32 1.0, %v86_v14  ;;  %v477_v48 = vld [vmem:[#allocation8 + $0x20] sm:$0xff]  ;;  %v479_v49 = vld [vmem:[#allocation8 + $0x28] sm:$0xff] }
  0x38   :  { %305 = vlog2.f32 %v92_v13  ;;  %v138_v28 = vadd.f32 1e-08, %v130_v19  ;;  %v176_v29 = vshrl.u32 %v175_v20, 7  ;;  %v139_v30 = vadd.f32 1e-08, %v131_v21  ;;  %v486_v54 = vld [vmem:[#allocation8 + $0x30] sm:$0xff] }
  0x39   :  { %307 = vlog2.f32 %v93_v15  ;;  %v178_v31 = vand.u32 127, %v175_v20  ;;  %v140_v32 = vadd.f32 1e-08, %v132_v23  ;;  %v141_v33 = vadd.f32 1e-08, %v133_v25  ;;  %v500_v61 = vld [vmem:[#allocation8 + $0x38] sm:$0xff] }
  0x3a   :  { %309 = vlog2.f32 %v94_v18  ;;  %v142_v34 = vadd.f32 1e-08, %v134_v27  ;;  %v467_v35 = vmul.u32 1024, %v176_v29  ;;  %v119_v55 = vsub.f32 1.0, %v469_v40  ;;  %v498_v59 = vld [vmem:[#allocation6] sm:$0x3] }
  0x3b   :  { %311 = vlog2.f32 %v135_v22  ;;  %v179_v36 = vadd.s32 128, %v178_v31  ;;  %v180_v37 = vadd.s32 256, %v178_v31  ;;  %v181_v38 = vadd.s32 384, %v178_v31 }
  0x3c   :  { %313 = vlog2.f32 %v136_v24  ;;  %v182_v41 = vadd.s32 512, %v178_v31  ;;  %v183_v46 = vadd.s32 640, %v178_v31  ;;  %v184_v50 = vadd.s32 768, %v178_v31 }
  0x3d   :  { %315 = vlog2.f32 %v137_v26  ;;  %v481_v51 = vadd.s32 896, %v178_v31  ;;  %v484_v52 = vadd.s32 %v467_v35, %v178_v31  ;;  %v490_v56 = vadd.s32 %v467_v35, %v179_v36 }
  0x3e   :  { %317 = vlog2.f32 %v138_v28  ;;  %v493_v57 = vadd.s32 %v467_v35, %v180_v37  ;;  %v496_v58 = vadd.s32 %v467_v35, %v181_v38  ;;  %v120_v62 = vsub.f32 1.0, %v471_v43 }
  0x3f   :  { %319 = vlog2.f32 %v139_v30  ;;  %v121_v63 = vsub.f32 1.0, %v473_v44  ;;  %v122_v0 = vsub.f32 1.0, %v475_v45  ;;  %v506_v1 = vadd.s32 %v467_v35, %v182_v41 }
  0x40   :  { %v296_v39 = vpop.eup %295  ;;  %321 = vlog2.f32 %v140_v32  ;;  %v123_v4 = vsub.f32 1.0, %v477_v48  ;;  %v124_v5 = vsub.f32 1.0, %v479_v49  ;;  %v511_v6 = vadd.s32 %v467_v35, %v183_v46 }
  0x41   :  { %v298_v42 = vpop.eup %297  ;;  %323 = vlog2.f32 %v141_v33  ;;  %v96_v3 = vmul.f32 0.6931472, %v296_v39  ;;  %v125_v9 = vsub.f32 1.0, %v486_v54  ;;  %v515_v10 = vadd.s32 %v467_v35, %v184_v50 }
  0x42   :  { %v300_v47 = vpop.eup %299  ;;  %325 = vlog2.f32 %v142_v34  ;;  %v98_v8 = vmul.f32 0.6931472, %v298_v42  ;;  %v242_v11 = vmul.f32 1.442695, %v498_v59  ;;  %v126_v15 = vsub.f32 1.0, %v500_v61 }
  0x43   :  { %v302_v53 = vpop.eup %301  ;;  %v100_v13 = vmul.f32 0.6931472, %v300_v47  ;;  %vm198_vm0 = vcmp.lt.s32.totalorder %v484_v52, 2048  ;;  %vm199_vm1 = vcmp.lt.s32.totalorder %v490_v56, 2048  ;;  %vm200_vm2 = vcmp.lt.s32.totalorder %v493_v57, 2048 }
  0x44   :  { %v304_v60 = vpop.eup %303  ;;  %v102_v14 = vmul.f32 0.6931472, %v302_v53  ;;  %vm201_vm3 = vcmp.lt.s32.totalorder %v496_v58, 2048  ;;  %v111_v20 = vmul.f32 %v96_v3, %v469_v40  ;;  %vm202_vm4 = vcmp.lt.s32.totalorder %v506_v1, 2048 }
  0x45   :  { %v306_v2 = vpop.eup %305  ;;  %v104_v17 = vmul.f32 0.6931472, %v304_v60  ;;  %v112_v24 = vmul.f32 %v98_v8, %v471_v43  ;;  %327 = vpow2.f32 %v242_v11  ;;  %v113_v27 = vmul.f32 %v100_v13, %v473_v44 }
  0x46   :  { %v308_v7 = vpop.eup %307  ;;  %v106_v19 = vmul.f32 0.6931472, %v306_v2  ;;  %v114_v28 = vmul.f32 %v102_v14, %v475_v45  ;;  %vm203_vm5 = vcmp.lt.s32.totalorder %v511_v6, 2048  ;;  %vm204_vm6 = vcmp.lt.s32.totalorder %v515_v10, 2048 }
  0x47   :  { %v310_v12 = vpop.eup %309  ;;  %v108_v23 = vmul.f32 0.6931472, %v308_v7  ;;  %v115_v33 = vmul.f32 %v104_v17, %v477_v48  ;;  %v237_v7 = vld [vmem:[#allocation3] sm:$0x3] }
  0x48   :  { %v312_v16 = vpop.eup %311  ;;  %v110_v32 = vmul.f32 0.6931472, %v310_v12  ;;  %v116_v38 = vmul.f32 %v106_v19, %v479_v49  ;;  %v239_v12 = vadd.f32 1.0, %v498_v59  ;;  %v240_v13 = vmul.f32 %v237_v7, %v237_v7 }
  0x49   :  { %v314_v18 = vpop.eup %313  ;;  %v144_v21 = vmul.f32 0.6931472, %v312_v16  ;;  %v117_v43 = vmul.f32 %v108_v23, %v486_v54 }
  0x4a   :  { %v316_v22 = vpop.eup %315  ;;  %v146_v25 = vmul.f32 0.6931472, %v314_v18  ;;  %v118_v8 = vmul.f32 %v110_v32, %v500_v61 }
  0x4b   :  { %v318_v26 = vpop.eup %317  ;;  %v148_v29 = vmul.f32 0.6931472, %v316_v22  ;;  %v159_v30 = vmul.f32 %v144_v21, %v119_v55 }
  0x4c   :  { %v320_v31 = vpop.eup %319  ;;  %v150_v34 = vmul.f32 0.6931472, %v318_v26  ;;  %v160_v36 = vmul.f32 %v146_v25, %v120_v62 }
  0x4d   :  { %v322_v37 = vpop.eup %321  ;;  %v152_v39 = vmul.f32 0.6931472, %v320_v31  ;;  %v161_v40 = vmul.f32 %v148_v29, %v121_v63  ;;  %v167_v41 = vadd.f32 %v159_v30, %v111_v20 }
  0x4e   :  { %v324_v42 = vpop.eup %323  ;;  %v154_v44 = vmul.f32 0.6931472, %v322_v37  ;;  %v162_v46 = vmul.f32 %v150_v34, %v122_v0  ;;  %v168_v45 = vadd.f32 %v160_v36, %v112_v24 }
  0x4f   :  { %v326_v47 = vpop.eup %325  ;;  %v156_v50 = vmul.f32 0.6931472, %v324_v42  ;;  %v163_v53 = vmul.f32 %v152_v39, %v123_v4  ;;  %v169_v55 = vadd.f32 %v161_v40, %v113_v27  ;;  %v206_v48 = vsel %vm198_vm0, %v167_v41, 0.0 }
  0x50   :  { %v158_v60 = vmul.f32 0.6931472, %v326_v47  ;;  %v164_v62 = vmul.f32 %v154_v44, %v124_v5  ;;  %v170_v2 = vadd.f32 %v162_v46, %v114_v28  ;;  %v207_v49 = vsel %vm199_vm1, %v168_v45, 0.0 }
  0x51   :  { %v165_v63 = vmul.f32 %v156_v50, %v125_v9  ;;  %v171_v3 = vadd.f32 %v163_v53, %v115_v33  ;;  %v208_v54 = vsel %vm200_vm2, %v169_v55, 0.0  ;;  %v215_v0 = vadd.f32 %v207_v49, %v206_v48 }
  0x52   :  { %v166_v4 = vmul.f32 %v158_v60, %v126_v15  ;;  %v172_v11 = vadd.f32 %v164_v62, %v116_v38  ;;  %v209_v52 = vsel %vm201_vm3, %v170_v2, 0.0  ;;  %v197_v5 = vadd.s32 %v467_v35, %v481_v51  ;;  %v328_v58 = vpop.eup %327 }
  0x53   :  { %v216_v56 = vadd.f32 %v215_v0, %v208_v54  ;;  %v173_v9 = vadd.f32 %v165_v63, %v117_v43  ;;  %v210_v57 = vsel %vm202_vm4, %v171_v3, 0.0  ;;  %v241_v35 = vsub.f32 %v239_v12, %v240_v13 }
  0x54   :  { %v174_v14 = vadd.f32 %v166_v4, %v118_v8  ;;  %v211_v15 = vsel %vm203_vm5, %v172_v11, 0.0  ;;  %vm205_vm7 = vcmp.lt.s32.totalorder %v197_v5, 2048 }
  0x55   :  { %v217_v61 = vadd.f32 %v216_v56, %v209_v52  ;;  %v212_v17 = vsel %vm204_vm6, %v173_v9, 0.0  ;;  %v244_v19 = vsub.f32 %v241_v35, %v328_v58 }
  0x56   :  { %v213_v6 = vsel %vm205_vm7, %v174_v14, 0.0 }
  0x57   :  { %v218_v16 = vadd.f32 %v217_v61, %v210_v57  ;;  %v246_v1 = vsel %vm245_vm8, %v244_v19, 0.0 }
  0x59   :  { %v219_v51 = vadd.f32 %v218_v16, %v211_v15 }
  0x5b   :  { %v220_v18 = vadd.f32 %v219_v51, %v212_v17 }
  0x5d   :  { %v221_v20 = vadd.f32 %v220_v18, %v213_v6 }
  0x5f   :  { %222 = vadd.xlane.f32.xlu0 %v221_v20 }
  0x63   :  { %247 = vadd.xlane.f32.xlu0 %v246_v1 }
  0xe8   :  { %v223_v59 = vpop.xlane.xlu0 %222 }
  0xe9   :  { %v224_v21 = vrot.slane %v223_v59, 4 }
  0xeb   :  { %v225_v10 = vadd.f32 %v224_v21, %v223_v59 }
  0xec   :  { %v248_v22 = vpop.xlane.xlu0 %247 }
  0xed   :  { %v226_v23 = vrot.slane %v225_v10, 2  ;;  %v249_v24 = vrot.slane %v248_v22, 4 }
  0xef   :  { %v250_v25 = vadd.f32 %v249_v24, %v248_v22  ;;  %v227_v26 = vadd.f32 %v226_v23, %v225_v10 }
  0xf1   :  { %v251_v27 = vrot.slane %v250_v25, 2  ;;  %v228_v28 = vrot.slane %v227_v26, 1 }
  0xf3   :  { %v252_v29 = vadd.f32 %v251_v27, %v250_v25  ;;  %v229_v30 = vadd.f32 %v228_v28, %v227_v26 }
  0xf5   :  { %286 = vpush %v229_v30  ;;  %v253_v31 = vrot.slane %v252_v29, 1 }
  0xf7   :  { %v254_v32 = vadd.f32 %v253_v31, %v252_v29 }
  0xf9   :  { %288 = vpush %v254_v32 }
 0x126   :  { %s287_s2 = spop %286 }
 0x127   :  { %s259_s3 = smul.f32 0.5, %s287_s2 }
 0x129   :  { %s264_s7 = smul.f32 -1.0, %s259_s3 }
 0x12a   :  { %s289_s8 = spop %288 }
 0x12b   :  { %266 = sst [smem:[#allocation11 + $0x1]] %s264_s7  ;;  %s256_s9 = smul.f32 0.5, %s289_s8 }
 0x12d   :  { %s257_s10 = smul.f32 0.5, %s256_s9 }
 0x12f   :  { %s260_s11 = sadd.f32 %s259_s3, %s257_s10  ;;  %s267_s12 = smul.f32 -1.0, %s257_s10 }
 0x131   :  { %s261_s13 = smul.f32 -1.0, %s260_s11  ;;  %269 = sst [smem:[#allocation11 + $0x2]] %s267_s12 }
 0x133   :  { %263 = sst [smem:[#allocation11]] %s261_s13 }
 0x134   :  { %277 = dma.smem_to_hbm %s429_s14, 16, %s554_s4, [#allocation5]  }
 0x135   :  { %423 = dma.done.wait [#allocation5], 16  }
 0x136   :  { %424 = vsyncadd [#allocation5], 4294967280 }
 0x137   :  { %281 = sfence }
 0x138   :  { %282 = vsyncpa [#allocation4], 1 }
 0x139   :  { %283 = vsyncpa [#allocation7], 1 }
 0x13a   :  { %284 = vsyncpa [#allocation10], 1 }
 0x13b   :  { %285 = vsyncpa [#allocation5], 1 }

</bundles_post_ra>
